<compile_context>
chip_gen: v7x
topology: tpu7x:2x2x1
jax: 0.10.0
libtpu: 0.0.40
codegen_flags: <defaults>
</compile_context>

<pallas_src>
import functools

import jax
import jax.numpy as jnp
from jax import lax
from jax.experimental import pallas as pl
from jax.experimental.pallas import tpu as pltpu


def _round_up(x, m):
    return ((x + m - 1) // m) * m


def _supcon_kernel(row_lab_ref, col_lab_ref, fa_ref, fb_ref,
                   s_ref, lse_ref,
                   m_sc, l_sc, s_sc,
                   *, inv_temp, n_contrast, tm, tk):
    """One (TM, TK) tile of the anchor x contrast similarity matrix.

    Grid: (row_block i, col_block k); k is the reduction ("arbitrary") axis.
    Per-row-block scratch (persistent across k):
      m_sc: running masked row max            [TM, 1]
      l_sc: running masked sum exp(sim - m)   [TM, 1]
      s_sc: running sum(pos_mask * sim)       [TM, 1]
    Outputs (written at the last k step):
      s_ref:   sum(pos_mask * sim)                      [TM, 1]
      lse_ref: log sum_{valid cols} exp(sim) (masked)   [TM, 1]
    """
    i = pl.program_id(0)
    k = pl.program_id(1)
    nk = pl.num_programs(1)

    @pl.when(k == 0)
    def _init():
        m_sc[...] = jnp.full_like(m_sc, -1e30)
        l_sc[...] = jnp.zeros_like(l_sc)
        s_sc[...] = jnp.zeros_like(s_sc)

    a = fa_ref[...]                                 # [TM, D] (bf16 or f32)
    b = fb_ref[...]                                 # [TK, D]
    contract = (((1,), (1,)), ((), ()))             # A @ B.T without a transpose
    sim = lax.dot_general(a, b, contract, preferred_element_type=jnp.float32)
    sim = sim * inv_temp                            # scale the [TM,TK] tile once

    # Rebuild masks in-kernel (no [N, N] mask traffic from HBM).
    # TODO(synk): specialize interior tiles (no diagonal / no ragged last
    # column block) to skip lmask construction + the where-masks once VALU
    # becomes the binding VLIW slot.
    row_ids = i * tm + lax.broadcasted_iota(jnp.int32, (tm, tk), 0)
    col_ids = k * tk + lax.broadcasted_iota(jnp.int32, (tm, tk), 1)
    lmask = jnp.logical_and(col_ids < n_contrast, row_ids != col_ids)
    pos = jnp.logical_and(row_lab_ref[...] == col_lab_ref[...], lmask)

    # Online masked log-sum-exp + fused positive-pair similarity sum.
    tile_max = jnp.max(jnp.where(lmask, sim, -1e30), axis=1, keepdims=True)
    m_new = jnp.maximum(m_sc[...], tile_max)
    alpha = jnp.exp(m_sc[...] - m_new)
    p_exp = jnp.where(lmask, jnp.exp(sim - m_new), 0.0)
    l_sc[...] = alpha * l_sc[...] + jnp.sum(p_exp, axis=1, keepdims=True)
    s_sc[...] = s_sc[...] + jnp.sum(jnp.where(pos, sim, 0.0),
                                    axis=1, keepdims=True)
    m_sc[...] = m_new

    @pl.when(k == nk - 1)
    def _finalize():
        s_ref[...] = s_sc[...]
        lse_ref[...] = m_sc[...] + jnp.log(l_sc[...])


def _pick_tiles(n_anchor, n_contrast, d_pad, itemsize, block_m, block_k,
                budget_bytes):
    """Clamp tiles to the problem and shrink until the VMEM estimate fits."""
    bm = min(block_m, _round_up(max(n_anchor, 8), 8))
    bk = min(block_k, _round_up(max(n_contrast, 128), 128))

    def est(bm_, bk_):
        feat = 2 * (bm_ + bk_) * d_pad * itemsize          # fa + fb, 2x buffered
        small = 2 * (bm_ * 4 + bk_ * 4)                     # labels, 2x buffered
        outs = 2 * 2 * bm_ * 4                              # two f32 outputs
        scratch = 3 * bm_ * 4
        return feat + small + outs + scratch

    while est(bm, bk) > budget_bytes and bk > 128:
        bk = max(128, ((bk // 2) // 128) * 128)
    while est(bm, bk) > budget_bytes and bm > 8:
        bm = max(8, ((bm // 2) // 8) * 8)
    return bm, bk, est(bm, bk)


def supcon_loss(features, labels=None, mask=None, *,
                temperature=0.07, contrast_mode='all', base_temperature=0.07,
                block_m=512, block_k=512, mxu_dtype=jnp.bfloat16,
                core_parallel=False, vmem_limit_bytes=None):
    """Pallas TPU equivalent of SupConLoss.forward (cosine similarity)."""
    # TODO(synk): 'Euclidean'/'Mahalanobis' similarity branches (host-side
    # numpy cov/inv) are not translated; only the default cosine path is.
    if features.ndim < 3:
        raise ValueError('`features` needs to be [bsz, n_views, ...], '
                         'at least 3 dimensions are required')
    if features.ndim > 3:
        features = features.reshape(features.shape[0], features.shape[1], -1)
    bsz, n_views, dim = features.shape

    if labels is not None and mask is not None:
        raise ValueError('Cannot define both `labels` and `mask`')
    if mask is not None:
        # TODO(synk): explicit (possibly asymmetric) `mask` argument is not
        # translated; only the labels / SimCLR (eye) paths are supported.
        raise NotImplementedError('explicit `mask` argument not supported')
    if labels is None:
        labels = jnp.arange(bsz, dtype=jnp.int32)   # eye(bsz) == unique labels
    else:
        labels = jnp.asarray(labels).reshape(-1).astype(jnp.int32)
        if labels.shape[0] != bsz:
            raise ValueError('Num of labels does not match num of features')

    # contrast_feature = torch.cat(torch.unbind(features, dim=1), dim=0)
    n_contrast = bsz * n_views
    contrast_feature = jnp.swapaxes(features, 0, 1).reshape(n_contrast, dim)
    contrast_labels = jnp.tile(labels, n_views)

    if contrast_mode == 'all':
        anchor_feature, anchor_labels, n_anchor = (
            contrast_feature, contrast_labels, n_contrast)
    elif contrast_mode == 'one':
        anchor_feature, anchor_labels, n_anchor = features[:, 0, :], labels, bsz
    else:
        raise ValueError('Unknown mode: {}'.format(contrast_mode))

    # Positives per anchor, computed analytically from the labels (so the
    # kernel never needs a per-tile positive-count reduction):
    #   pos(i) = n_views * |{j in batch : label_j == label_i}| - 1   (minus self)
    counts = jnp.sum((labels[:, None] == labels[None, :]).astype(jnp.float32),
                     axis=1)
    pos_per_sample = n_views * counts - 1.0
    if contrast_mode == 'all':
        pos_anchor = jnp.tile(pos_per_sample, n_views)
    else:
        pos_anchor = pos_per_sample

    d_pad = _round_up(dim, 128)
    itemsize = jnp.dtype(mxu_dtype).itemsize
    bm, bk, vmem_est = _pick_tiles(n_anchor, n_contrast, d_pad, itemsize,
                                   block_m, block_k, budget_bytes=40 << 20)
    na_pad = _round_up(max(n_anchor, bm), bm)
    nc_pad = _round_up(max(n_contrast, bk), bk)

    # Pad to lane-dense, tile-aligned shapes (zero rows/cols do not change A@B.T).
    # MXU operands are cast in the wrapper (bf16 by default); LSE math stays f32.
    fa = jnp.pad(anchor_feature, ((0, na_pad - n_anchor), (0, d_pad - dim))
                 ).astype(mxu_dtype)
    fb = jnp.pad(contrast_feature, ((0, nc_pad - n_contrast), (0, d_pad - dim))
                 ).astype(mxu_dtype)
    row_lab = jnp.pad(anchor_labels, (0, na_pad - n_anchor),
                      constant_values=-1).reshape(na_pad, 1)
    col_lab = jnp.pad(contrast_labels, (0, nc_pad - n_contrast),
                      constant_values=-1).reshape(1, nc_pad)

    grid = (na_pad // bm, nc_pad // bk)

    kernel = functools.partial(
        _supcon_kernel,
        inv_temp=1.0 / float(temperature),
        n_contrast=n_contrast, tm=bm, tk=bk)

    if core_parallel:
        dim_sem = (pltpu.CORE_PARALLEL, pltpu.ARBITRARY)   # v7x: split rows over TCs
    else:
        dim_sem = ('parallel', 'arbitrary')
    cp_kwargs = dict(dimension_semantics=dim_sem)
    if vmem_limit_bytes is not None:
        cp_kwargs['vmem_limit_bytes'] = int(vmem_limit_bytes)
    elif vmem_est > (10 << 20):
        # Large-D configs can exceed the smallest default scoped limit (v5e:
        # 16 MiB); raise it with headroom but stay under v7x's 64 MiB physical.
        cp_kwargs['vmem_limit_bytes'] = min(vmem_est + (16 << 20), 60 << 20)

    s_out, lse_out = pl.pallas_call(
        kernel,
        out_shape=(jax.ShapeDtypeStruct((na_pad, 1), jnp.float32),
                   jax.ShapeDtypeStruct((na_pad, 1), jnp.float32)),
        grid_spec=pltpu.PrefetchScalarGridSpec(
            num_scalar_prefetch=0,
            grid=grid,
            in_specs=[
                pl.BlockSpec((bm, 1), lambda i, k: (i, 0)),       # row labels
                pl.BlockSpec((1, bk), lambda i, k: (0, k)),       # col labels
                pl.BlockSpec((bm, d_pad), lambda i, k: (i, 0)),   # anchor rows
                pl.BlockSpec((bk, d_pad), lambda i, k: (k, 0)),   # contrast rows
            ],
            out_specs=[pl.BlockSpec((bm, 1), lambda i, k: (i, 0)),
                       pl.BlockSpec((bm, 1), lambda i, k: (i, 0))],
            scratch_shapes=[pltpu.VMEM((bm, 1), jnp.float32)
                            for _ in range(3)],
        ),
        compiler_params=pltpu.CompilerParams(**cp_kwargs),
    )(row_lab, col_lab, fa, fb)

    # O(N) finalize outside the kernel (padded anchor rows are dropped here).
    s = s_out[:n_anchor, 0]
    lse = lse_out[:n_anchor, 0]
    mean_log_prob_pos = s / pos_anchor - lse
    loss = -(float(temperature) / float(base_temperature)) * mean_log_prob_pos
    # loss.view(anchor_count, batch_size).mean() == mean over all real anchors
    return jnp.mean(loss)


def _supcon_loss_ref(features, labels=None, temperature=0.07,
                     base_temperature=0.07):
    """Pure-JAX reference mirroring the PyTorch forward (cosine, mode='all')."""
    bsz, n_views, dim = features.shape
    cf = jnp.swapaxes(features, 0, 1).reshape(bsz * n_views, dim)
    n = bsz * n_views
    if labels is None:
        labels = jnp.arange(bsz)
    labels = labels.reshape(-1, 1)
    m = (labels == labels.T).astype(jnp.float32)
    m = jnp.tile(m, (n_views, n_views))
    lm = jnp.ones((n, n), jnp.float32) - jnp.eye(n, dtype=jnp.float32)
    m = m * lm
    sim = (cf @ cf.T) / temperature
    logits = sim - jnp.max(sim, axis=1, keepdims=True)
    exp_logits = jnp.exp(logits) * lm
    log_prob = logits - jnp.log(jnp.sum(exp_logits, axis=1, keepdims=True))
    mean_log_prob_pos = jnp.sum(m * log_prob, axis=1) / jnp.sum(m, axis=1)
    loss = -(temperature / base_temperature) * mean_log_prob_pos
    return jnp.mean(loss)


if __name__ == '__main__':
    key = jax.random.PRNGKey(0)
    k1, k2, k3, k4 = jax.random.split(key, 4)

    # Small test: bsz=8, n_views=2, dim=32 (supervised labels path).
    bsz, n_views, dim = 8, 2, 32
    feats = jax.random.normal(k1, (bsz, n_views, dim), dtype=jnp.float32)
    feats = feats / jnp.linalg.norm(feats, axis=-1, keepdims=True)
    labels = jax.random.randint(k2, (bsz,), 0, 3)

    ref = _supcon_loss_ref(feats, labels)
    # f32 MXU path: exact parity with the reference.
    loss_f32 = jax.block_until_ready(
        supcon_loss(feats, labels=labels, mxu_dtype=jnp.float32))
    assert jnp.allclose(loss_f32, ref, rtol=1e-4, atol=1e-4), (loss_f32, ref)
    # Default bf16 MXU path (f32 softmax math): looser tolerance.
    loss_bf16 = jax.block_until_ready(supcon_loss(feats, labels=labels))
    assert jnp.allclose(loss_bf16, ref, rtol=5e-2, atol=5e-2), (loss_bf16, ref)

    # SimCLR (unsupervised) path: labels == mask == None.
    ref_u = _supcon_loss_ref(feats, None)
    loss_u = jax.block_until_ready(supcon_loss(feats, mxu_dtype=jnp.float32))
    assert jnp.allclose(loss_u, ref_u, rtol=1e-4, atol=1e-4), (loss_u, ref_u)

    # Shape exercising padding + multi-tile online reduction (grid (2,2)).
    bsz2, nv2, dim2 = 96, 2, 48   # N = 192 -> padded to 256 with 128-tiles
    feats2 = jax.random.normal(k3, (bsz2, nv2, dim2), dtype=jnp.float32)
    feats2 = feats2 / jnp.linalg.norm(feats2, axis=-1, keepdims=True)
    labels2 = jax.random.randint(k4, (bsz2,), 0, 10)
    ref2 = _supcon_loss_ref(feats2, labels2)
    loss2_f32 = jax.block_until_ready(
        supcon_loss(feats2, labels=labels2, block_m=128, block_k=128,
                    mxu_dtype=jnp.float32))
    assert jnp.allclose(loss2_f32, ref2, rtol=1e-4, atol=1e-4), (loss2_f32, ref2)
    # Default large-tile bf16 config on the same problem (single big tile).
    loss2_bf16 = jax.block_until_ready(supcon_loss(feats2, labels=labels2))
    assert jnp.allclose(loss2_bf16, ref2, rtol=5e-2, atol=5e-2), (loss2_bf16, ref2)

    print("KERNEL_OK")
</pallas_src>

<mosaic_0001>
module attributes {stable_mosaic.version = 11 : i64} {
  func.func @_supcon_kernel(%arg0: i32, %arg1: i32, %arg2: memref<16x1xi32, #tpu.memory_space<vmem>>, %arg3: memref<1x128xi32, #tpu.memory_space<vmem>>, %arg4: memref<16x128xf32, #tpu.memory_space<vmem>>, %arg5: memref<128x128xf32, #tpu.memory_space<vmem>>, %arg6: memref<16x1xf32, #tpu.memory_space<vmem>>, %arg7: memref<16x1xf32, #tpu.memory_space<vmem>>, %arg8: memref<16x1xf32, #tpu.memory_space<vmem>>, %arg9: memref<16x1xf32, #tpu.memory_space<vmem>>, %arg10: memref<16x1xf32, #tpu.memory_space<vmem>>) attributes {dimension_semantics = [#tpu.dimension_semantics<parallel>, #tpu.dimension_semantics<arbitrary>], iteration_bounds = array<i64: 1, 1>, scalar_prefetch = 0 : i64, scratch_operands = 3 : i64, tpu.core_type = #tpu.core_type<tc>, window_params = [{transform_indices = @transform_0, window_bounds = array<i64: 16, 1>}, {transform_indices = @transform_1, window_bounds = array<i64: 1, 128>}, {transform_indices = @transform_2, window_bounds = array<i64: 16, 128>}, {transform_indices = @transform_3, window_bounds = array<i64: 128, 128>}, {transform_indices = @transform_4, window_bounds = array<i64: 16, 1>}, {transform_indices = @transform_5, window_bounds = array<i64: 16, 1>}]} {
    %c0_i32 = arith.constant 0 : i32
    %0 = arith.cmpi eq, %arg1, %c0_i32 : i32
    %1 = arith.extui %0 : i1 to i32
    %c0_i32_0 = arith.constant 0 : i32
    %2 = arith.cmpi ne, %1, %c0_i32_0 : i32
    scf.if %2 {
      %cst_32 = arith.constant -1.000000e+30 : f32
      %57 = vector.broadcast %cst_32 : f32 to vector<16x1xf32>
      %c0_33 = arith.constant 0 : index
      %c0_34 = arith.constant 0 : index
      %58 = vector.load %arg8[%c0_33, %c0_34] : memref<16x1xf32, #tpu.memory_space<vmem>>, vector<16x1xf32>
      tpu.vector_store %arg8[%c0_33, %c0_34], %57 {strides = array<i32>} : memref<16x1xf32, #tpu.memory_space<vmem>>, vector<16x1xf32>,
      %cst_35 = arith.constant 0.000000e+00 : f32
      %59 = vector.broadcast %cst_35 : f32 to vector<16x1xf32>
      %c0_36 = arith.constant 0 : index
      %c0_37 = arith.constant 0 : index
      %60 = vector.load %arg9[%c0_36, %c0_37] : memref<16x1xf32, #tpu.memory_space<vmem>>, vector<16x1xf32>
      tpu.vector_store %arg9[%c0_36, %c0_37], %59 {strides = array<i32>} : memref<16x1xf32, #tpu.memory_space<vmem>>, vector<16x1xf32>,
      %cst_38 = arith.constant 0.000000e+00 : f32
      %61 = vector.broadcast %cst_38 : f32 to vector<16x1xf32>
      %c0_39 = arith.constant 0 : index
      %c0_40 = arith.constant 0 : index
      %62 = vector.load %arg10[%c0_39, %c0_40] : memref<16x1xf32, #tpu.memory_space<vmem>>, vector<16x1xf32>
      tpu.vector_store %arg10[%c0_39, %c0_40], %61 {strides = array<i32>} : memref<16x1xf32, #tpu.memory_space<vmem>>, vector<16x1xf32>,
    } else {
    }
    %c0 = arith.constant 0 : index
    %c0_1 = arith.constant 0 : index
    %3 = vector.load %arg4[%c0, %c0_1] : memref<16x128xf32, #tpu.memory_space<vmem>>, vector<16x128xf32>
    %c0_2 = arith.constant 0 : index
    %c0_3 = arith.constant 0 : index
    %4 = vector.load %arg5[%c0_2, %c0_3] : memref<128x128xf32, #tpu.memory_space<vmem>>, vector<128x128xf32>
    %cst = arith.constant dense<0.000000e+00> : vector<16x128xf32>
    %5 = tpu.matmul %3, %4, %cst {dimension_numbers = #tpu.dot_dimension_numbers<[1], [1], [0], [0], [0, 0, 1, 0], [], []>} : vector<16x128xf32>, vector<128x128xf32>, vector<16x128xf32> -> vector<16x128xf32>
    %cst_4 = arith.constant 14.2857141 : f32
    %6 = vector.broadcast %cst_4 : f32 to vector<16x128xf32>
    %7 = arith.mulf %5, %6 : vector<16x128xf32>
    %c16_i32 = arith.constant 16 : i32
    %8 = arith.muli %arg0, %c16_i32 : i32
    %9 = tpu.iota {dimensions = array<i32: 0>} : vector<16x128xi32>
    %10 = vector.broadcast %8 : i32 to vector<16x128xi32>
    %11 = arith.addi %10, %9 : vector<16x128xi32>
    %c128_i32 = arith.constant 128 : i32
    %12 = arith.muli %arg1, %c128_i32 : i32
    %13 = tpu.iota {dimensions = array<i32: 1>} : vector<16x128xi32>
    %14 = vector.broadcast %12 : i32 to vector<16x128xi32>
    %15 = arith.addi %14, %13 : vector<16x128xi32>
    %c16_i32_5 = arith.constant 16 : i32
    %16 = vector.broadcast %c16_i32_5 : i32 to vector<16x128xi32>
    %17 = arith.cmpi slt, %15, %16 : vector<16x128xi32>
    %18 = arith.cmpi ne, %11, %15 : vector<16x128xi32>
    %19 = arith.andi %17, %18 : vector<16x128xi1>
    %c0_6 = arith.constant 0 : index
    %c0_7 = arith.constant 0 : index
    %20 = vector.load %arg2[%c0_6, %c0_7] : memref<16x1xi32, #tpu.memory_space<vmem>>, vector<16x1xi32>
    %c0_8 = arith.constant 0 : index
    %c0_9 = arith.constant 0 : index
    %21 = vector.load %arg3[%c0_8, %c0_9] : memref<1x128xi32, #tpu.memory_space<vmem>>, vector<1x128xi32>
    %22 = vector.broadcast %20 : vector<16x1xi32> to vector<16x128xi32>
    %23 = vector.broadcast %21 : vector<1x128xi32> to vector<16x128xi32>
    %24 = arith.cmpi eq, %22, %23 : vector<16x128xi32>
    %25 = arith.andi %24, %19 : vector<16x128xi1>
    %cst_10 = arith.constant -1.000000e+30 : f32
    %26 = vector.broadcast %cst_10 : f32 to vector<16x128xf32>
    %27 = arith.select %19, %7, %26 : vector<16x128xi1>, vector<16x128xf32>
    %cst_11 = arith.constant dense<0xFF800000> : vector<16xf32>
    %28 = vector.multi_reduction <maximumf>, %27, %cst_11 [1] : vector<16x128xf32> to vector<16xf32>
    %29 = vector.shape_cast %28 : vector<16xf32> to vector<16x1xf32>
    %c0_12 = arith.constant 0 : index
    %c0_13 = arith.constant 0 : index
    %30 = vector.load %arg8[%c0_12, %c0_13] : memref<16x1xf32, #tpu.memory_space<vmem>>, vector<16x1xf32>
    %31 = arith.maximumf %30, %29 : vector<16x1xf32>
    %c0_14 = arith.constant 0 : index
    %c0_15 = arith.constant 0 : index
    %32 = vector.load %arg8[%c0_14, %c0_15] : memref<16x1xf32, #tpu.memory_space<vmem>>, vector<16x1xf32>
    %33 = arith.subf %32, %31 : vector<16x1xf32>
    %34 = math.exp %33 : vector<16x1xf32>
    %35 = vector.broadcast %31 : vector<16x1xf32> to vector<16x128xf32>
    %36 = arith.subf %7, %35 : vector<16x128xf32>
    %37 = math.exp %36 : vector<16x128xf32>
    %cst_16 = arith.constant 0.000000e+00 : f32
    %38 = vector.broadcast %cst_16 : f32 to vector<16x128xf32>
    %39 = arith.select %19, %37, %38 : vector<16x128xi1>, vector<16x128xf32>
    %c0_17 = arith.constant 0 : index
    %c0_18 = arith.constant 0 : index
    %40 = vector.load %arg9[%c0_17, %c0_18] : memref<16x1xf32, #tpu.memory_space<vmem>>, vector<16x1xf32>
    %41 = arith.mulf %34, %40 : vector<16x1xf32>
    %cst_19 = arith.constant dense<0.000000e+00> : vector<16xf32>
    %42 = vector.multi_reduction <add>, %39, %cst_19 [1] : vector<16x128xf32> to vector<16xf32>
    %43 = vector.shape_cast %42 : vector<16xf32> to vector<16x1xf32>
    %44 = arith.addf %41, %43 : vector<16x1xf32>
    %c0_20 = arith.constant 0 : index
    %c0_21 = arith.constant 0 : index
    %45 = vector.load %arg9[%c0_20, %c0_21] : memref<16x1xf32, #tpu.memory_space<vmem>>, vector<16x1xf32>
    tpu.vector_store %arg9[%c0_20, %c0_21], %44 {strides = array<i32>} : memref<16x1xf32, #tpu.memory_space<vmem>>, vector<16x1xf32>,
    %c0_22 = arith.constant 0 : index
    %c0_23 = arith.constant 0 : index
    %46 = vector.load %arg10[%c0_22, %c0_23] : memref<16x1xf32, #tpu.memory_space<vmem>>, vector<16x1xf32>
    %cst_24 = arith.constant 0.000000e+00 : f32
    %47 = vector.broadcast %cst_24 : f32 to vector<16x128xf32>
    %48 = arith.select %25, %7, %47 : vector<16x128xi1>, vector<16x128xf32>
    %cst_25 = arith.constant dense<0.000000e+00> : vector<16xf32>
    %49 = vector.multi_reduction <add>, %48, %cst_25 [1] : vector<16x128xf32> to vector<16xf32>
    %50 = vector.shape_cast %49 : vector<16xf32> to vector<16x1xf32>
    %51 = arith.addf %46, %50 : vector<16x1xf32>
    %c0_26 = arith.constant 0 : index
    %c0_27 = arith.constant 0 : index
    %52 = vector.load %arg10[%c0_26, %c0_27] : memref<16x1xf32, #tpu.memory_space<vmem>>, vector<16x1xf32>
    tpu.vector_store %arg10[%c0_26, %c0_27], %51 {strides = array<i32>} : memref<16x1xf32, #tpu.memory_space<vmem>>, vector<16x1xf32>,
    %c0_28 = arith.constant 0 : index
    %c0_29 = arith.constant 0 : index
    %53 = vector.load %arg8[%c0_28, %c0_29] : memref<16x1xf32, #tpu.memory_space<vmem>>, vector<16x1xf32>
    tpu.vector_store %arg8[%c0_28, %c0_29], %31 {strides = array<i32>} : memref<16x1xf32, #tpu.memory_space<vmem>>, vector<16x1xf32>,
    %c0_i32_30 = arith.constant 0 : i32
    %54 = arith.cmpi eq, %arg1, %c0_i32_30 : i32
    %55 = arith.extui %54 : i1 to i32
    %c0_i32_31 = arith.constant 0 : i32
    %56 = arith.cmpi ne, %55, %c0_i32_31 : i32
    scf.if %56 {
      %c0_32 = arith.constant 0 : index
      %c0_33 = arith.constant 0 : index
      %57 = vector.load %arg10[%c0_32, %c0_33] : memref<16x1xf32, #tpu.memory_space<vmem>>, vector<16x1xf32>
      %c0_34 = arith.constant 0 : index
      %c0_35 = arith.constant 0 : index
      %58 = vector.load %arg6[%c0_34, %c0_35] : memref<16x1xf32, #tpu.memory_space<vmem>>, vector<16x1xf32>
      tpu.vector_store %arg6[%c0_34, %c0_35], %57 {strides = array<i32>} : memref<16x1xf32, #tpu.memory_space<vmem>>, vector<16x1xf32>,
      %c0_36 = arith.constant 0 : index
      %c0_37 = arith.constant 0 : index
      %59 = vector.load %arg8[%c0_36, %c0_37] : memref<16x1xf32, #tpu.memory_space<vmem>>, vector<16x1xf32>
      %c0_38 = arith.constant 0 : index
      %c0_39 = arith.constant 0 : index
      %60 = vector.load %arg9[%c0_38, %c0_39] : memref<16x1xf32, #tpu.memory_space<vmem>>, vector<16x1xf32>
      %61 = math.log %60 : vector<16x1xf32>
      %62 = arith.addf %59, %61 : vector<16x1xf32>
      %c0_40 = arith.constant 0 : index
      %c0_41 = arith.constant 0 : index
      %63 = vector.load %arg7[%c0_40, %c0_41] : memref<16x1xf32, #tpu.memory_space<vmem>>, vector<16x1xf32>
      tpu.vector_store %arg7[%c0_40, %c0_41], %62 {strides = array<i32>} : memref<16x1xf32, #tpu.memory_space<vmem>>, vector<16x1xf32>,
    } else {
    }
    return
  }
  func.func @transform_0(%arg0: i32, %arg1: i32) -> (i32, i32) {
    %c0_i32 = arith.constant 0 : i32
    %c0_i32_0 = arith.constant 0 : i32
    return %arg0, %c0_i32 : i32, i32
  }
  func.func @transform_1(%arg0: i32, %arg1: i32) -> (i32, i32) {
    %c0_i32 = arith.constant 0 : i32
    %c0_i32_0 = arith.constant 0 : i32
    return %c0_i32, %arg1 : i32, i32
  }
  func.func @transform_2(%arg0: i32, %arg1: i32) -> (i32, i32) {
    %c0_i32 = arith.constant 0 : i32
    %c0_i32_0 = arith.constant 0 : i32
    return %arg0, %c0_i32 : i32, i32
  }
  func.func @transform_3(%arg0: i32, %arg1: i32) -> (i32, i32) {
    %c0_i32 = arith.constant 0 : i32
    %c0_i32_0 = arith.constant 0 : i32
    return %arg1, %c0_i32 : i32, i32
  }
  func.func @transform_4(%arg0: i32, %arg1: i32) -> (i32, i32) {
    %c0_i32 = arith.constant 0 : i32
    %c0_i32_0 = arith.constant 0 : i32
    return %arg0, %c0_i32 : i32, i32
  }
  func.func @transform_5(%arg0: i32, %arg1: i32) -> (i32, i32) {
    %c0_i32 = arith.constant 0 : i32
    %c0_i32_0 = arith.constant 0 : i32
    return %arg0, %c0_i32 : i32, i32
  }
}

</mosaic_0001>

<bundles_post_ra>
// kernel: tpu_custom_call.1
= control target key start
LH: loop header
LB: loop body
LE: loop exit
PB: predicated region body
PF: predicated region fallthrough
CT: control target
= control target key end

     0   :  { %11 = vsyncpa [#allocation6], 0  ;;  %s392_s18 = smov [#allocation5]   ;;  %s503_s0 = inlined_call_operand.vmem [shape: s32[16,1], index: 0, kind: input, shape index: {}]   ;;  %s504_s1 = inlined_call_operand.vmem [shape: s32[1,128], index: 1, kind: input, shape index: {}]   ;;  %s505_s2 = inlined_call_operand.vmem [shape: f32[16,128], index: 2, kind: input, shape index: {}]   ;;  %s506_s3 = inlined_call_operand.hbm [shape: f32[128,128], index: 3, kind: input, shape index: {}]   ;;  %s507_s4 = inlined_call_operand.vmem [shape: f32[16,1], index: 4, kind: output, shape index: {0}]   ;;  %s508_s5 = inlined_call_operand.vmem [shape: f32[16,1], index: 5, kind: output, shape index: {1}]  }
   0x1   :  { %s23_s19 = sshll.u32 %s392_s18, 4  ;;  %s368_s22 = scalar_lea.hbm %s506_s3, 2048  ;;  %s24_s19 = int_to_ptr.vmem [resolvable:$true] %s23_s19 }
   0x2   :  { %p369_p0 = scmp.ne.s32.totalorder %s506_s3, %s368_s22  ;;  %p372_p1 = scmp.lt.u32.totalorder %s368_s22, %s506_s3 }
   0x4   :  { %p374_p2 = pnand %p372_p1, %p369_p0 }
   0x6   :  { %377 = shalt.err (!%p374_p2)
}
   0x7   :  { %s378_s27 = scalar_lea.vmem %s24_s19, 2048  ;;  %p383_p4 = scmp.lt.s32.totalorder %s24_s19, %s24_s19 }
   0x8   :  { %p379_p3 = scmp.ne.s32.totalorder %s24_s19, %s378_s27  ;;  %p384_p5 = scmp.lt.s32.totalorder %s378_s27, %s378_s27 }
   0xa   :  { %p385_p6 = por %p384_p5, %p383_p4 }
   0xc   :  { %p386_p7 = pnand %p385_p6, %p379_p3 }
   0xe   :  { %389 = shalt.err (!%p386_p7)
}
   0xf   :  { %s393_s28 = smov 128   ;;  %s394_s29 = smov 8  }
  0x10   :  { %29 = dma.hbm_to_vmem [thread:$0]  %s506_s3, 2048, %s24_s19, [#allocation6], %s393_s28, %s393_s28, %s394_s29  }
  0x11   :  { %390 = dma.done.wait [#allocation6], 2048  }
  0x12   :  { %391 = vsyncadd [#allocation6], 4294965248  ;;  %v46_v0 = vld [vmem:[#allocation5] sm:$0xff]  ;;  %v47_v1 = vld [vmem:[#allocation5 + $0x8] sm:$0xff]  ;;  %v395_v26 = vmov 0   ;;  %vm37_vm0 = vcmask 7168   ;;  %v140_v28 = vlaneseq }
  0x13   :  { %v48_v2 = vld [vmem:[#allocation5 + $0x10] sm:$0xff]  ;;  %v316_v3 = vpack.c.bf16 %v47_v1, %v46_v0  ;;  %v49_v4 = vld [vmem:[#allocation5 + $0x18] sm:$0xff]  ;;  %v50_v7 = vld [vmem:[#allocation5 + $0x20] sm:$0xff]  ;;  %355 = vset.pattern.permute.xlu0 %v395_v26  ;;  %354 = vset.pattern.permute.xlu1 %v395_v26  ;;  %v396_v27 = vmov -1e+30   ;;  %v397_v41 = vmov 0.0  }
  0x14   :  { %v320_v5 = vpack.c.bf16 %v49_v4, %v48_v2  ;;  %v44_v6 = vld [vmem:[%s505_s2] sm:$0xff]  ;;  %v51_v8 = vld [vmem:[#allocation5 + $0x28] sm:$0xff]  ;;  %v53_v11 = vld [vmem:[#allocation5 + $0x38] sm:$0xff]  ;;  %38 = vst.msk [vmem:[#allocation2] sm:$0xff] %vm37_vm0, %v396_v27  ;;  %v141_v29 = vshrl.u32 %v140_v28, 7  ;;  %v148_v30 = vand.u32 127, %v140_v28 }
  0x15   :  { %317 = vmatprep.subr.bf16.mxu0 %v316_v3  ;;  %313 = vmatprep.mubr.f32.mxu0 %v44_v6  ;;  %v324_v9 = vpack.c.bf16 %v51_v8, %v50_v7  ;;  %v52_v10 = vld [vmem:[#allocation5 + $0x30] sm:$0xff]  ;;  %v54_v13 = vld [vmem:[#allocation5 + $0x40] sm:$0xff]  ;;  %v55_v14 = vld [vmem:[#allocation5 + $0x48] sm:$0xff]  ;;  %39 = vst.msk [vmem:[#allocation2 + $0x8] sm:$0xff] %vm37_vm0, %v396_v27 }
  0x16   :  { %319 = vmatpush3.bf16.xpose.msra.mxu0 %v316_v3  ;;  %v328_v12 = vpack.c.bf16 %v53_v11, %v52_v10  ;;  %v332_v15 = vpack.c.bf16 %v55_v14, %v54_v13  ;;  %v56_v16 = vld [vmem:[#allocation5 + $0x50] sm:$0xff]  ;;  %v57_v17 = vld [vmem:[#allocation5 + $0x58] sm:$0xff]  ;;  %v58_v19 = vld [vmem:[#allocation5 + $0x60] sm:$0xff]  ;;  %vm151_vm1 = vcmp.lt.s32.totalorder %v148_v30, 16  ;;  %vm152_vm2 = vcmp.ne.s32.totalorder %v141_v29, %v148_v30  ;;  %42 = vst.msk [vmem:[#allocation4] sm:$0xff] %vm37_vm0, %v397_v41 }
  0x17   :  { %321 = vmatprep.subr.bf16.mxu0 %v320_v5  ;;  %v336_v18 = vpack.c.bf16 %v57_v17, %v56_v16  ;;  %v59_v20 = vld [vmem:[#allocation5 + $0x68] sm:$0xff]  ;;  %v60_v22 = vld [vmem:[#allocation5 + $0x70] sm:$0xff]  ;;  %v61_v23 = vld [vmem:[#allocation5 + $0x78] sm:$0xff]  ;;  %v142_v31 = vadd.s32 8, %v141_v29  ;;  %40 = vst.msk [vmem:[#allocation3] sm:$0xff] %vm37_vm0, %v397_v41 }
  0x18   :  { %v340_v21 = vpack.c.bf16 %v59_v20, %v58_v19  ;;  %v344_v24 = vpack.c.bf16 %v61_v23, %v60_v22  ;;  %v45_v25 = vld [vmem:[%s505_s2 + $0x8] sm:$0xff]  ;;  %vm448_vm3 = vmand %vm151_vm1, %vm152_vm2  ;;  %v156_v40 = vld [vmem:[%s503_s0] sm:$0xff]  ;;  %41 = vst.msk [vmem:[#allocation3 + $0x8] sm:$0xff] %vm37_vm0, %v397_v41 }
  0x19   :  { %vm153_vm4 = vcmp.ne.s32.totalorder %v142_v31, %v148_v30  ;;  %43 = vst.msk [vmem:[#allocation4 + $0x8] sm:$0xff] %vm37_vm0, %v397_v41  ;;  %v157_v50 = vld [vmem:[%s503_s0 + $0x8] sm:$0xff]  ;;  %v262_v51 = vld [vmem:[%s504_s1] ss:$0 sm:$0xff] }
  0x1a   :  { %vm454_vm5 = vmand %vm151_vm1, %vm153_vm4 }
  0x1b   :  { %v179_v42 = vld [vmem:[#allocation2] sm:$0xff] }
  0x1c   :  { %v180_v45 = vld [vmem:[#allocation2 + $0x8] sm:$0xff] }
  0x1d   :  { %v220_v2 = vld [vmem:[#allocation4] sm:$0xff] }
  0x1e   :  { %323 = vmatpush3.bf16.xpose.msra.mxu0 %v320_v5 }
  0x1f   :  { %325 = vmatprep.subr.bf16.mxu0 %v324_v9  ;;  %v208_v13 = vld [vmem:[#allocation3 + $0x8] sm:$0xff] }
  0x26   :  { %327 = vmatpush3.bf16.xpose.msra.mxu0 %v324_v9  ;;  %v207_v9 = vld [vmem:[#allocation3] sm:$0xff] }
  0x27   :  { %329 = vmatprep.subr.bf16.mxu0 %v328_v12 }
  0x2e   :  { %331 = vmatpush3.bf16.xpose.msra.mxu0 %v328_v12 }
  0x2f   :  { %333 = vmatprep.subr.bf16.mxu0 %v332_v15 }
  0x36   :  { %335 = vmatpush3.bf16.xpose.msra.mxu0 %v332_v15 }
  0x37   :  { %337 = vmatprep.subr.bf16.mxu0 %v336_v18 }
  0x3e   :  { %339 = vmatpush3.bf16.xpose.msra.mxu0 %v336_v18  ;;  %v221_v18 = vld [vmem:[#allocation4 + $0x8] sm:$0xff] }
  0x3f   :  { %341 = vmatprep.subr.bf16.mxu0 %v340_v21 }
  0x46   :  { %343 = vmatpush3.bf16.xpose.msra.mxu0 %v340_v21 }
  0x47   :  { %345 = vmatprep.subr.bf16.mxu0 %v344_v24 }
  0x4e   :  { %347 = vmatpush3.bf16.xpose.msra.mxu0 %v344_v24 }
  0x55   :  { %314 = vmatmul.mubr.f32.vlgmr.msra.gmra.mrb[0].mxu0 %v45_v25 }
 0x128   :  { %v315_v32 = vpop.f32.mrb[0].mxu0 }
 0x129   :  { %v128_v33 = vpop.f32.mrb[1].mxu0  ;;  %v138_v36 = vmul.f32 14.285714, %v315_v32 }
 0x12a   :  { %v137_v35 = vmul.f32 14.285714, %v128_v33 }
 0x12b   :  { %v174_v39 = vsel %vm454_vm5, %v138_v36, -1e+30 }
 0x12c   :  { %v173_v37 = vsel %vm448_vm3, %v137_v35, -1e+30 }
 0x12d   :  { %175 = vmax.xlane.f32.xlu0 %v173_v37 }
 0x131   :  { %177 = vmax.xlane.f32.xlu0 %v174_v39 }
 0x147   :  { %160 = vperm.xlu0 %355, %v156_v40  }
 0x1ba   :  { %v176_v43 = vpop.xlane.xlu0 %175 }
 0x1bb   :  { %v181_v44 = vmax.f32 %v179_v42, %v176_v43 }
 0x1bd   :  { %v183_v46 = vsub.f32 %v179_v42, %v181_v44  ;;  %232 = vst.msk [vmem:[#allocation2] sm:$0xff] %vm37_vm0, %v181_v44  ;;  %191 = vperm.xlu1 %354, %v181_v44  }
 0x1be   :  { %v178_v47 = vpop.xlane.xlu0 %177 }
 0x1bf   :  { %v182_v48 = vmax.f32 %v180_v45, %v178_v47  ;;  %v185_v6 = vmul.f32 1.442695, %v183_v46 }
 0x1c1   :  { %v184_v49 = vsub.f32 %v180_v45, %v182_v48  ;;  %233 = vst.msk [vmem:[#allocation2 + $0x8] sm:$0xff] %vm37_vm0, %v182_v48  ;;  %196 = vperm.xlu1 %354, %v182_v48  }
 0x1c3   :  { %v187_v7 = vmul.f32 1.442695, %v184_v49 }
 0x1c4   :  { %v241_v26 = vld [vmem:[#allocation2] sm:$0xff] }
 0x1c5   :  { %163 = vperm.xlu1 %354, %v157_v50  }
 0x1c6   :  { %v161_v52 = vpop.permute.xlu0 %160 }
 0x1c7   :  { %vm169_vm6 = vcmp.eq.s32.totalorder %v161_v52, %v262_v51 }
 0x1c8   :  { %vm171_vm7 = vmand %vm169_vm6, %vm448_vm3  ;;  %v242_v30 = vld [vmem:[#allocation2 + $0x8] sm:$0xff] }
 0x1c9   :  { %v222_v53 = vsel %vm171_vm7, %v137_v35, 0.0 }
 0x1ca   :  { %224 = vadd.xlane.f32.xlu0 %v222_v53 }
 0x23c   :  { %v192_v54 = vpop.permute.xlu1 %191 }
 0x23d   :  { %v199_v55 = vsub.f32 %v137_v35, %v192_v54 }
 0x23f   :  { %v201_v56 = vmul.f32 1.442695, %v199_v55 }
 0x240   :  { %v197_v57 = vpop.permute.xlu1 %196 }
 0x241   :  { %356 = vpow2.f32 %v201_v56  ;;  %v200_v58 = vsub.f32 %v138_v36, %v197_v57 }
 0x243   :  { %v203_v59 = vmul.f32 1.442695, %v200_v58 }
 0x244   :  { %v164_v61 = vpop.permute.xlu1 %163 }
 0x245   :  { %358 = vpow2.f32 %v203_v59  ;;  %vm170_vm8 = vcmp.eq.s32.totalorder %v164_v61, %v262_v51 }
 0x246   :  { %vm172_vm9 = vmand %vm170_vm8, %vm454_vm5  ;;  %360 = vpow2.f32 %v185_v6 }
 0x247   :  { %v223_v1 = vsel %vm172_vm9, %v138_v36, 0.0  ;;  %362 = vpow2.f32 %v187_v7 }
 0x24b   :  { %v357_v60 = vpop.eup %356 }
 0x24c   :  { %v205_v62 = vsel %vm448_vm3, %v357_v60, 0.0 }
 0x24d   :  { %211 = vadd.xlane.f32.xlu1 %v205_v62 }
 0x24f   :  { %v359_v63 = vpop.eup %358 }
 0x250   :  { %v206_v0 = vsel %vm454_vm5, %v359_v63, 0.0  ;;  %v361_v8 = vpop.eup %360 }
 0x251   :  { %213 = vadd.xlane.f32.xlu1 %v206_v0  ;;  %v209_v10 = vmul.f32 %v361_v8, %v207_v9  ;;  %v363_v11 = vpop.eup %362 }
 0x252   :  { %v210_v15 = vmul.f32 %v363_v11, %v208_v13 }
 0x255   :  { %226 = vadd.xlane.f32.xlu1 %v223_v1 }
 0x257   :  { %v225_v3 = vpop.xlane.xlu0 %224 }
 0x258   :  { %v228_v4 = vadd.f32 %v225_v3, %v220_v2 }
 0x25a   :  { %230 = vst.msk [vmem:[#allocation4] sm:$0xff] %vm37_vm0, %v228_v4 }
 0x261   :  { %v237_v5 = vld [vmem:[#allocation4] sm:$0xff] }
 0x262   :  { %239 = vst.msk [vmem:[%s507_s4] sm:$0xff] %vm37_vm0, %v237_v5 }
 0x2da   :  { %v212_v12 = vpop.xlane.xlu1 %211 }
 0x2db   :  { %v215_v14 = vadd.f32 %v212_v12, %v209_v10 }
 0x2dd   :  { %218 = vst.msk [vmem:[#allocation3] sm:$0xff] %vm37_vm0, %v215_v14 }
 0x2de   :  { %v214_v16 = vpop.xlane.xlu1 %213 }
 0x2df   :  { %v216_v17 = vadd.f32 %v214_v16, %v210_v15 }
 0x2e1   :  { %219 = vst.msk [vmem:[#allocation3 + $0x8] sm:$0xff] %vm37_vm0, %v216_v17 }
 0x2e2   :  { %v227_v19 = vpop.xlane.xlu1 %226 }
 0x2e3   :  { %v229_v20 = vadd.f32 %v227_v19, %v221_v18 }
 0x2e4   :  { %v243_v21 = vld [vmem:[#allocation3] sm:$0xff] }
 0x2e5   :  { %364 = vlog2.f32 %v243_v21  ;;  %231 = vst.msk [vmem:[#allocation4 + $0x8] sm:$0xff] %vm37_vm0, %v229_v20 }
 0x2e8   :  { %v244_v22 = vld [vmem:[#allocation3 + $0x8] sm:$0xff] }
 0x2e9   :  { %366 = vlog2.f32 %v244_v22 }
 0x2ec   :  { %v238_v23 = vld [vmem:[#allocation4 + $0x8] sm:$0xff] }
 0x2ed   :  { %240 = vst.msk [vmem:[%s507_s4 + $0x8] sm:$0xff] %vm37_vm0, %v238_v23 }
 0x2ef   :  { %v365_v24 = vpop.eup %364 }
 0x2f0   :  { %v246_v25 = vmul.f32 0.6931472, %v365_v24 }
 0x2f2   :  { %v249_v27 = vadd.f32 %v246_v25, %v241_v26 }
 0x2f3   :  { %v367_v28 = vpop.eup %366 }
 0x2f4   :  { %251 = vst.msk [vmem:[%s508_s5] sm:$0xff] %vm37_vm0, %v249_v27  ;;  %v248_v29 = vmul.f32 0.6931472, %v367_v28 }
 0x2f6   :  { %v250_v31 = vadd.f32 %v248_v29, %v242_v30 }
 0x2f8   :  { %252 = vst.msk [vmem:[%s508_s5 + $0x8] sm:$0xff] %vm37_vm0, %v250_v31 }
 0x2f9   :  { %261 = vsyncpa [#allocation6], 1 }

</bundles_post_ra>
